<compile_context>
chip_gen: v7x
topology: tpu7x:2x2x1
jax: 0.10.0
libtpu: 0.0.40
codegen_flags: <defaults>
</compile_context>

<pallas_src>
import functools

import numpy as np
import jax
import jax.numpy as jnp
from jax import lax
from jax.experimental import pallas as pl
from jax.experimental.pallas import tpu as pltpu

EPS = 1e-5  # BatchNorm2d default eps


def _hardswish(x):
    return x * jnp.clip(x + 3.0, 0.0, 6.0) * (1.0 / 6.0)


def _hardsigmoid(x):
    return jnp.clip(x + 3.0, 0.0, 6.0) * (1.0 / 6.0)


def _csenet_kernel(x_ref, w_ref, b_ref, wt_ref, out_ref, *,
                   width, C, S, O, band):
    """One slab of nb images: x (C, L) -> out (O, L); L = nb*H*W on lanes."""
    L = x_ref.shape[1]

    x = x_ref[...]                                   # (C, L) bf16

    # Consolidated parameter slabs (loaded once per grid step).
    w_all = w_ref[...]                               # (R, 3*band) bf16
    w1 = w_all[0:S, 0:C]                             # (S, C)
    w3 = w_all[0:C, band:band + S]                   # (C, S)
    wp = w_all[0:O, 2 * band:2 * band + C]           # (O, C)
    b_all = b_ref[...]                               # (R, 4) f32
    b1 = b_all[0:S, 0:1]
    bd = b_all[0:S, 1:2]
    b3 = b_all[0:C, 2:3]
    bp = b_all[0:O, 3:4]

    # ---- fusion[0]: 1x1 conv (+ folded BN) + Hardswish ---------------------
    y1 = _hardswish(jnp.dot(w1, x, preferred_element_type=jnp.float32) + b1)

    # ---- fusion[1]: depthwise 3x3, pad=1 (+ folded BN) + Hardswish ---------
    # shifted[p] = y1[p + dh*W + dw] via lane rotation; wt[k] already contains
    # the per-channel tap weight * 0/1 border mask (which also zeroes the
    # cyclic wrap at image borders / image seams of the batch-folded axis).
    acc = y1 * wt_ref[4]                             # center tap (mask == 1)
    for k in range(9):                               # statically unrolled
        if k == 4:
            continue
        d = (k // 3 - 1) * width + (k % 3 - 1)       # flat-index tap offset
        shifted = pltpu.roll(y1, shift=(-d) % L, axis=1)
        acc = acc + shifted * wt_ref[k]
    y2 = _hardswish(acc + bd)                        # (S, L) f32

    # ---- fusion[2]: 1x1 conv (+ bias, no norm) + Hardsigmoid ---------------
    gate = _hardsigmoid(
        jnp.dot(w3, y2.astype(jnp.bfloat16),
                preferred_element_type=jnp.float32) + b3)   # (C, L) f32

    # ---- project: 1x1 conv (+ folded BN) on x * gate -----------------------
    fused = (x.astype(jnp.float32) * gate).astype(jnp.bfloat16)
    out = jnp.dot(wp, fused, preferred_element_type=jnp.float32) + bp
    out_ref[...] = out.astype(out_ref.dtype)         # lane-dense (O, L) store


def init_params(key, in_planes, out_planes, shrink_dim):
    C, O, S = in_planes, out_planes, shrink_dim
    ks = jax.random.split(key, 20)
    p = {
        # fusion[0]: Conv2d(C, S, 1) + BatchNorm2d(S)
        'w1': jax.random.normal(ks[0], (S, C, 1, 1), jnp.float32) * 0.2,
        'b1': jax.random.normal(ks[1], (S,), jnp.float32) * 0.1,
        'bn1_g': 1.0 + 0.1 * jax.random.normal(ks[2], (S,), jnp.float32),
        'bn1_b': 0.1 * jax.random.normal(ks[3], (S,), jnp.float32),
        'bn1_m': 0.1 * jax.random.normal(ks[4], (S,), jnp.float32),
        'bn1_v': 0.5 + jax.random.uniform(ks[5], (S,), jnp.float32),
        # fusion[1]: Conv2d(S, S, 3, groups=S) + BatchNorm2d(S)
        'wd': jax.random.normal(ks[6], (S, 1, 3, 3), jnp.float32) * 0.2,
        'bd': jax.random.normal(ks[7], (S,), jnp.float32) * 0.1,
        'bn2_g': 1.0 + 0.1 * jax.random.normal(ks[8], (S,), jnp.float32),
        'bn2_b': 0.1 * jax.random.normal(ks[9], (S,), jnp.float32),
        'bn2_m': 0.1 * jax.random.normal(ks[10], (S,), jnp.float32),
        'bn2_v': 0.5 + jax.random.uniform(ks[11], (S,), jnp.float32),
        # fusion[2]: Conv2d(S, C, 1) (no norm)
        'w3': jax.random.normal(ks[12], (C, S, 1, 1), jnp.float32) * 0.2,
        'b3': jax.random.normal(ks[13], (C,), jnp.float32) * 0.1,
        # project: Conv2d(C, O, 1) + BatchNorm2d(O)
        'wp': jax.random.normal(ks[14], (O, C, 1, 1), jnp.float32) * 0.2,
        'bp': jax.random.normal(ks[15], (O,), jnp.float32) * 0.1,
        'bnp_g': 1.0 + 0.1 * jax.random.normal(ks[16], (O,), jnp.float32),
        'bnp_b': 0.1 * jax.random.normal(ks[17], (O,), jnp.float32),
        'bnp_m': 0.1 * jax.random.normal(ks[18], (O,), jnp.float32),
        'bnp_v': 0.5 + jax.random.uniform(ks[19], (O,), jnp.float32),
    }
    return p


def _make_tap_masks(H, W):
    """np (9, H*W) 0/1 masks: tap k valid where (h+k//3-1, w+k%3-1) in-bounds."""
    h = np.arange(H)[:, None]
    w = np.arange(W)[None, :]
    masks = []
    for k in range(9):
        dh, dw = k // 3 - 1, k % 3 - 1
        m = ((h + dh >= 0) & (h + dh < H) & (w + dw >= 0) & (w + dw < W))
        masks.append(m.reshape(-1))
    return np.stack(masks).astype(np.float32)


def _fold_params(p, H, W, nb):
    """Fold eval-mode BN; pack params into consolidated kernel-layout slabs."""
    S, C = p['w1'].shape[0], p['w1'].shape[1]
    O = p['wp'].shape[0]

    s1 = p['bn1_g'] / jnp.sqrt(p['bn1_v'] + EPS)
    w1f = p['w1'][:, :, 0, 0] * s1[:, None]                        # (S, C)
    b1f = (p['b1'] - p['bn1_m']) * s1 + p['bn1_b']                 # (S,)

    s2 = p['bn2_g'] / jnp.sqrt(p['bn2_v'] + EPS)
    wdf = p['wd'][:, 0].reshape(S, 9) * s2[:, None]                # (S, 9)
    bdf = (p['bd'] - p['bn2_m']) * s2 + p['bn2_b']                 # (S,)

    w3f = p['w3'][:, :, 0, 0]                                      # (C, S)
    b3f = p['b3']                                                  # (C,)

    sp = p['bnp_g'] / jnp.sqrt(p['bnp_v'] + EPS)
    wpf = p['wp'][:, :, 0, 0] * sp[:, None]                        # (O, C)
    bpf = (p['bp'] - p['bnp_m']) * sp + p['bnp_b']                 # (O,)

    # One bf16 weight slab, 128-lane aligned bands: [w1 | w3 | wp].
    band = 128 * max(1, -(-max(C, S) // 128))
    R = 8 * (-(-max(S, C, O) // 8))
    wslab = jnp.zeros((R, 3 * band), jnp.float32)
    wslab = wslab.at[:S, 0:C].set(w1f)
    wslab = wslab.at[:C, band:band + S].set(w3f)
    wslab = wslab.at[:O, 2 * band:2 * band + C].set(wpf)
    wslab = wslab.astype(jnp.bfloat16)

    # One f32 bias slab, columns: [b1 | bd | b3 | bp] (channels on sublanes).
    bslab = jnp.zeros((R, 4), jnp.float32)
    bslab = bslab.at[:S, 0].set(b1f)
    bslab = bslab.at[:S, 1].set(bdf)
    bslab = bslab.at[:C, 2].set(b3f)
    bslab = bslab.at[:O, 3].set(bpf)

    # Masked per-tap depthwise weights: wt[k, s, :] = wdf[s, k] * mask[k, :],
    # tiled over the nb images of one lane slab (subsumes the old mask input).
    masks = jnp.asarray(np.tile(_make_tap_masks(H, W), (1, nb)))   # (9, nb*HW)
    wt = (wdf.T[:, :, None] * masks[:, None, :]).astype(jnp.float32)

    return wslab, bslab, wt, R, band


def csenet_forward(x_nchw, params, *, max_block_lanes=4096):
    # TODO(synk): BatchNorm is folded in inference (eval) mode with running
    # statistics; training-mode batch statistics are not reproduced.
    # TODO(synk): for production resolutions (HW*4B per channel approaching
    # the VMEM budget, esp. v7x's 64 MiB) add spatial lane tiling with a 1-row
    # halo and an explicit vmem_limit_bytes; here whole images ride on lanes.
    N, C, H, W = x_nchw.shape
    S = params['w1'].shape[0]
    O = params['wp'].shape[0]
    HW = H * W

    # Images per grid step: fold as much of the batch as fits the lane budget
    # (largest divisor of N). Lane-axis blocks must be 128-aligned unless they
    # span the full axis, so fall back to a single whole-batch block if HW is
    # not a multiple of 128.
    nb = 1
    for d in range(1, N + 1):
        if N % d == 0 and d * HW <= max_block_lanes:
            nb = d
    if HW % 128 != 0:
        nb = N
    L = nb * HW
    grid = (N // nb,)

    # NCHW -> channel-major with batch folded into the lane axis: (C, N*HW).
    # bf16 activations: halves HBM traffic; all consumers are bf16 MXU / gate.
    x_cl = jnp.transpose(x_nchw, (1, 0, 2, 3)).reshape(C, N * HW)
    x_cl = x_cl.astype(jnp.bfloat16)

    wslab, bslab, wt, R, band = _fold_params(params, H, W, nb)

    flops = int(2 * N * HW * (C * S + 9 * S + S * C + C * O))
    bytes_accessed = int(2 * C * N * HW + 4 * O * N * HW
                         + 2 * wslab.size + 4 * bslab.size + 4 * wt.size)

    out_cl = pl.pallas_call(
        functools.partial(_csenet_kernel, width=W, C=C, S=S, O=O, band=band),
        out_shape=jax.ShapeDtypeStruct((O, N * HW), jnp.float32),
        grid_spec=pltpu.PrefetchScalarGridSpec(
            num_scalar_prefetch=0,
            grid=grid,
            in_specs=[
                pl.BlockSpec((C, L), lambda b: (0, b)),          # activations
                pl.BlockSpec((R, 3 * band), lambda b: (0, 0)),   # weight slab
                pl.BlockSpec((R, 4), lambda b: (0, 0)),          # bias slab
                pl.BlockSpec((9, S, L), lambda b: (0, 0, 0)),    # tap weights
            ],
            out_specs=pl.BlockSpec((O, L), lambda b: (0, b)),
        ),
        compiler_params=pltpu.CompilerParams(
            # grid steps (batch slabs) are independent -> megacore sharding
            dimension_semantics=("parallel",)),
        cost_estimate=pl.CostEstimate(flops=flops, transcendentals=0,
                                      bytes_accessed=bytes_accessed),
    )(x_cl, wslab, bslab, wt)

    return jnp.transpose(out_cl.reshape(O, N, H, W), (1, 0, 2, 3))


def reference_forward(x, p):
    """Pure-JAX NCHW reference mirroring the PyTorch module (eval mode)."""
    S = p['w1'].shape[0]
    dn = ('NCHW', 'OIHW', 'NCHW')
    hi = lax.Precision.HIGHEST

    def bn(y, g, b, m, v):
        return ((y - m[None, :, None, None])
                / jnp.sqrt(v + EPS)[None, :, None, None]
                * g[None, :, None, None] + b[None, :, None, None])

    y = lax.conv_general_dilated(x, p['w1'], (1, 1), 'VALID',
                                 dimension_numbers=dn, precision=hi)
    y = y + p['b1'][None, :, None, None]
    y = _hardswish(bn(y, p['bn1_g'], p['bn1_b'], p['bn1_m'], p['bn1_v']))

    y = lax.conv_general_dilated(y, p['wd'], (1, 1), ((1, 1), (1, 1)),
                                 dimension_numbers=dn, feature_group_count=S,
                                 precision=hi)
    y = y + p['bd'][None, :, None, None]
    y = _hardswish(bn(y, p['bn2_g'], p['bn2_b'], p['bn2_m'], p['bn2_v']))

    y = lax.conv_general_dilated(y, p['w3'], (1, 1), 'VALID',
                                 dimension_numbers=dn, precision=hi)
    y = y + p['b3'][None, :, None, None]
    gate = _hardsigmoid(y)

    z = x * gate
    z = lax.conv_general_dilated(z, p['wp'], (1, 1), 'VALID',
                                 dimension_numbers=dn, precision=hi)
    z = z + p['bp'][None, :, None, None]
    return bn(z, p['bnp_g'], p['bnp_b'], p['bnp_m'], p['bnp_v'])


if __name__ == "__main__":
    N, C, H, W = 2, 16, 16, 16      # in_planes = 16
    out_planes, shrink_factor = 8, 4
    S = C // shrink_factor          # shrink_dim = 4

    key = jax.random.PRNGKey(0)
    kx, kp = jax.random.split(key)
    x = jax.random.normal(kx, (N, C, H, W), jnp.float32)
    params = init_params(kp, C, out_planes, S)

    out = csenet_forward(x, params)
    out = jax.block_until_ready(out)
    assert out.shape == (N, out_planes, H, W)

    ref = reference_forward(x, params)
    # Kernel carries activations in bf16 and runs the 1x1 convs on the MXU
    # with bf16 inputs / f32 accumulation, hence bf16-level tolerance.
    np.testing.assert_allclose(np.asarray(out), np.asarray(ref),
                               rtol=3e-2, atol=3e-2)
    print("KERNEL_OK")
</pallas_src>

<mosaic_0001>
module attributes {stable_mosaic.version = 11 : i64} {
  func.func @_csenet_kernel(%arg0: i32, %arg1: memref<16x512xbf16, #tpu.memory_space<vmem>>, %arg2: memref<16x384xbf16, #tpu.memory_space<vmem>>, %arg3: memref<16x4xf32, #tpu.memory_space<vmem>>, %arg4: memref<9x4x512xf32, #tpu.memory_space<vmem>>, %arg5: memref<8x512xf32, #tpu.memory_space<vmem>>) attributes {dimension_semantics = [#tpu.dimension_semantics<parallel>], iteration_bounds = array<i64: 1>, scalar_prefetch = 0 : i64, scratch_operands = 0 : i64, tpu.core_type = #tpu.core_type<tc>, window_params = [{transform_indices = @transform_0, window_bounds = array<i64: 16, 512>}, {pipeline_mode = #tpu.pipeline_mode<synchronous>, transform_indices = @transform_1, window_bounds = array<i64: 16, 384>}, {pipeline_mode = #tpu.pipeline_mode<synchronous>, transform_indices = @transform_2, window_bounds = array<i64: 16, 4>}, {pipeline_mode = #tpu.pipeline_mode<synchronous>, transform_indices = @transform_3, window_bounds = array<i64: 9, 4, 512>}, {transform_indices = @transform_4, window_bounds = array<i64: 8, 512>}]} {
    %c0 = arith.constant 0 : index
    %c0_0 = arith.constant 0 : index
    %0 = vector.load %arg1[%c0, %c0_0] : memref<16x512xbf16, #tpu.memory_space<vmem>>, vector<16x512xbf16>
    %c0_1 = arith.constant 0 : index
    %c0_2 = arith.constant 0 : index
    %1 = vector.load %arg2[%c0_1, %c0_2] : memref<16x384xbf16, #tpu.memory_space<vmem>>, vector<16x384xbf16>
    %2 = vector.extract_strided_slice %1 {offsets = [0, 0], sizes = [4, 16], strides = [1, 1]} : vector<16x384xbf16> to vector<4x16xbf16>
    %3 = vector.extract_strided_slice %1 {offsets = [0, 128], sizes = [16, 4], strides = [1, 1]} : vector<16x384xbf16> to vector<16x4xbf16>
    %4 = vector.extract_strided_slice %1 {offsets = [0, 256], sizes = [8, 16], strides = [1, 1]} : vector<16x384xbf16> to vector<8x16xbf16>
    %c0_3 = arith.constant 0 : index
    %c0_4 = arith.constant 0 : index
    %5 = vector.load %arg3[%c0_3, %c0_4] : memref<16x4xf32, #tpu.memory_space<vmem>>, vector<16x4xf32>
    %6 = vector.extract_strided_slice %5 {offsets = [0, 0], sizes = [4, 1], strides = [1, 1]} : vector<16x4xf32> to vector<4x1xf32>
    %7 = vector.extract_strided_slice %5 {offsets = [0, 1], sizes = [4, 1], strides = [1, 1]} : vector<16x4xf32> to vector<4x1xf32>
    %8 = vector.extract_strided_slice %5 {offsets = [0, 2], sizes = [16, 1], strides = [1, 1]} : vector<16x4xf32> to vector<16x1xf32>
    %9 = vector.extract_strided_slice %5 {offsets = [0, 3], sizes = [8, 1], strides = [1, 1]} : vector<16x4xf32> to vector<8x1xf32>
    %cst = arith.constant dense<0.000000e+00> : vector<4x512xf32>
    %10 = tpu.matmul %2, %0, %cst {dimension_numbers = #tpu.dot_dimension_numbers<[1], [0], [0], [1], [0, 0, 1, 1], [], []>} : vector<4x16xbf16>, vector<16x512xbf16>, vector<4x512xf32> -> vector<4x512xf32>
    %11 = vector.broadcast %6 : vector<4x1xf32> to vector<4x512xf32>
    %12 = arith.addf %10, %11 : vector<4x512xf32>
    %cst_5 = arith.constant 3.000000e+00 : f32
    %13 = vector.broadcast %cst_5 : f32 to vector<4x512xf32>
    %14 = arith.addf %12, %13 : vector<4x512xf32>
    %cst_6 = arith.constant 0.000000e+00 : f32
    %cst_7 = arith.constant 6.000000e+00 : f32
    %15 = vector.broadcast %cst_6 : f32 to vector<4x512xf32>
    %16 = arith.maximumf %15, %14 : vector<4x512xf32>
    %17 = vector.broadcast %cst_7 : f32 to vector<4x512xf32>
    %18 = arith.minimumf %17, %16 : vector<4x512xf32>
    %19 = arith.mulf %12, %18 : vector<4x512xf32>
    %cst_8 = arith.constant 0.166666672 : f32
    %20 = vector.broadcast %cst_8 : f32 to vector<4x512xf32>
    %21 = arith.mulf %19, %20 : vector<4x512xf32>
    %c4 = arith.constant 4 : index
    %c0_9 = arith.constant 0 : index
    %c0_10 = arith.constant 0 : index
    %22 = vector.load %arg4[%c4, %c0_9, %c0_10] : memref<9x4x512xf32, #tpu.memory_space<vmem>>, vector<1x4x512xf32>
    %23 = vector.shape_cast %22 : vector<1x4x512xf32> to vector<4x512xf32>
    %24 = arith.mulf %21, %23 : vector<4x512xf32>
    %c17_i32 = arith.constant 17 : i32
    %25 = tpu.dynamic_rotate %21 by %c17_i32 dim 1 : vector<4x512xf32>, i32 -> vector<4x512xf32>
    %c0_11 = arith.constant 0 : index
    %c0_12 = arith.constant 0 : index
    %c0_13 = arith.constant 0 : index
    %26 = vector.load %arg4[%c0_11, %c0_12, %c0_13] : memref<9x4x512xf32, #tpu.memory_space<vmem>>, vector<1x4x512xf32>
    %27 = vector.shape_cast %26 : vector<1x4x512xf32> to vector<4x512xf32>
    %28 = arith.mulf %25, %27 : vector<4x512xf32>
    %29 = arith.addf %24, %28 : vector<4x512xf32>
    %c16_i32 = arith.constant 16 : i32
    %30 = tpu.dynamic_rotate %21 by %c16_i32 dim 1 : vector<4x512xf32>, i32 -> vector<4x512xf32>
    %c1 = arith.constant 1 : index
    %c0_14 = arith.constant 0 : index
    %c0_15 = arith.constant 0 : index
    %31 = vector.load %arg4[%c1, %c0_14, %c0_15] : memref<9x4x512xf32, #tpu.memory_space<vmem>>, vector<1x4x512xf32>
    %32 = vector.shape_cast %31 : vector<1x4x512xf32> to vector<4x512xf32>
    %33 = arith.mulf %30, %32 : vector<4x512xf32>
    %34 = arith.addf %29, %33 : vector<4x512xf32>
    %c15_i32 = arith.constant 15 : i32
    %35 = tpu.dynamic_rotate %21 by %c15_i32 dim 1 : vector<4x512xf32>, i32 -> vector<4x512xf32>
    %c2 = arith.constant 2 : index
    %c0_16 = arith.constant 0 : index
    %c0_17 = arith.constant 0 : index
    %36 = vector.load %arg4[%c2, %c0_16, %c0_17] : memref<9x4x512xf32, #tpu.memory_space<vmem>>, vector<1x4x512xf32>
    %37 = vector.shape_cast %36 : vector<1x4x512xf32> to vector<4x512xf32>
    %38 = arith.mulf %35, %37 : vector<4x512xf32>
    %39 = arith.addf %34, %38 : vector<4x512xf32>
    %c1_i32 = arith.constant 1 : i32
    %40 = tpu.dynamic_rotate %21 by %c1_i32 dim 1 : vector<4x512xf32>, i32 -> vector<4x512xf32>
    %c3 = arith.constant 3 : index
    %c0_18 = arith.constant 0 : index
    %c0_19 = arith.constant 0 : index
    %41 = vector.load %arg4[%c3, %c0_18, %c0_19] : memref<9x4x512xf32, #tpu.memory_space<vmem>>, vector<1x4x512xf32>
    %42 = vector.shape_cast %41 : vector<1x4x512xf32> to vector<4x512xf32>
    %43 = arith.mulf %40, %42 : vector<4x512xf32>
    %44 = arith.addf %39, %43 : vector<4x512xf32>
    %c511_i32 = arith.constant 511 : i32
    %45 = tpu.dynamic_rotate %21 by %c511_i32 dim 1 : vector<4x512xf32>, i32 -> vector<4x512xf32>
    %c5 = arith.constant 5 : index
    %c0_20 = arith.constant 0 : index
    %c0_21 = arith.constant 0 : index
    %46 = vector.load %arg4[%c5, %c0_20, %c0_21] : memref<9x4x512xf32, #tpu.memory_space<vmem>>, vector<1x4x512xf32>
    %47 = vector.shape_cast %46 : vector<1x4x512xf32> to vector<4x512xf32>
    %48 = arith.mulf %45, %47 : vector<4x512xf32>
    %49 = arith.addf %44, %48 : vector<4x512xf32>
    %c497_i32 = arith.constant 497 : i32
    %50 = tpu.dynamic_rotate %21 by %c497_i32 dim 1 : vector<4x512xf32>, i32 -> vector<4x512xf32>
    %c6 = arith.constant 6 : index
    %c0_22 = arith.constant 0 : index
    %c0_23 = arith.constant 0 : index
    %51 = vector.load %arg4[%c6, %c0_22, %c0_23] : memref<9x4x512xf32, #tpu.memory_space<vmem>>, vector<1x4x512xf32>
    %52 = vector.shape_cast %51 : vector<1x4x512xf32> to vector<4x512xf32>
    %53 = arith.mulf %50, %52 : vector<4x512xf32>
    %54 = arith.addf %49, %53 : vector<4x512xf32>
    %c496_i32 = arith.constant 496 : i32
    %55 = tpu.dynamic_rotate %21 by %c496_i32 dim 1 : vector<4x512xf32>, i32 -> vector<4x512xf32>
    %c7 = arith.constant 7 : index
    %c0_24 = arith.constant 0 : index
    %c0_25 = arith.constant 0 : index
    %56 = vector.load %arg4[%c7, %c0_24, %c0_25] : memref<9x4x512xf32, #tpu.memory_space<vmem>>, vector<1x4x512xf32>
    %57 = vector.shape_cast %56 : vector<1x4x512xf32> to vector<4x512xf32>
    %58 = arith.mulf %55, %57 : vector<4x512xf32>
    %59 = arith.addf %54, %58 : vector<4x512xf32>
    %c495_i32 = arith.constant 495 : i32
    %60 = tpu.dynamic_rotate %21 by %c495_i32 dim 1 : vector<4x512xf32>, i32 -> vector<4x512xf32>
    %c8 = arith.constant 8 : index
    %c0_26 = arith.constant 0 : index
    %c0_27 = arith.constant 0 : index
    %61 = vector.load %arg4[%c8, %c0_26, %c0_27] : memref<9x4x512xf32, #tpu.memory_space<vmem>>, vector<1x4x512xf32>
    %62 = vector.shape_cast %61 : vector<1x4x512xf32> to vector<4x512xf32>
    %63 = arith.mulf %60, %62 : vector<4x512xf32>
    %64 = arith.addf %59, %63 : vector<4x512xf32>
    %65 = vector.broadcast %7 : vector<4x1xf32> to vector<4x512xf32>
    %66 = arith.addf %64, %65 : vector<4x512xf32>
    %cst_28 = arith.constant 3.000000e+00 : f32
    %67 = vector.broadcast %cst_28 : f32 to vector<4x512xf32>
    %68 = arith.addf %66, %67 : vector<4x512xf32>
    %cst_29 = arith.constant 0.000000e+00 : f32
    %cst_30 = arith.constant 6.000000e+00 : f32
    %69 = vector.broadcast %cst_29 : f32 to vector<4x512xf32>
    %70 = arith.maximumf %69, %68 : vector<4x512xf32>
    %71 = vector.broadcast %cst_30 : f32 to vector<4x512xf32>
    %72 = arith.minimumf %71, %70 : vector<4x512xf32>
    %73 = arith.mulf %66, %72 : vector<4x512xf32>
    %cst_31 = arith.constant 0.166666672 : f32
    %74 = vector.broadcast %cst_31 : f32 to vector<4x512xf32>
    %75 = arith.mulf %73, %74 : vector<4x512xf32>
    %76 = arith.truncf %75 : vector<4x512xf32> to vector<4x512xbf16>
    %cst_32 = arith.constant dense<0.000000e+00> : vector<16x512xf32>
    %77 = tpu.matmul %3, %76, %cst_32 {dimension_numbers = #tpu.dot_dimension_numbers<[1], [0], [0], [1], [0, 0, 1, 1], [], []>} : vector<16x4xbf16>, vector<4x512xbf16>, vector<16x512xf32> -> vector<16x512xf32>
    %78 = vector.broadcast %8 : vector<16x1xf32> to vector<16x512xf32>
    %79 = arith.addf %77, %78 : vector<16x512xf32>
    %cst_33 = arith.constant 3.000000e+00 : f32
    %80 = vector.broadcast %cst_33 : f32 to vector<16x512xf32>
    %81 = arith.addf %79, %80 : vector<16x512xf32>
    %cst_34 = arith.constant 0.000000e+00 : f32
    %cst_35 = arith.constant 6.000000e+00 : f32
    %82 = vector.broadcast %cst_34 : f32 to vector<16x512xf32>
    %83 = arith.maximumf %82, %81 : vector<16x512xf32>
    %84 = vector.broadcast %cst_35 : f32 to vector<16x512xf32>
    %85 = arith.minimumf %84, %83 : vector<16x512xf32>
    %cst_36 = arith.constant 0.166666672 : f32
    %86 = vector.broadcast %cst_36 : f32 to vector<16x512xf32>
    %87 = arith.mulf %85, %86 : vector<16x512xf32>
    %88 = arith.extf %0 : vector<16x512xbf16> to vector<16x512xf32>
    %89 = arith.mulf %88, %87 : vector<16x512xf32>
    %90 = arith.truncf %89 : vector<16x512xf32> to vector<16x512xbf16>
    %cst_37 = arith.constant dense<0.000000e+00> : vector<8x512xf32>
    %91 = tpu.matmul %4, %90, %cst_37 {dimension_numbers = #tpu.dot_dimension_numbers<[1], [0], [0], [1], [0, 0, 1, 1], [], []>} : vector<8x16xbf16>, vector<16x512xbf16>, vector<8x512xf32> -> vector<8x512xf32>
    %92 = vector.broadcast %9 : vector<8x1xf32> to vector<8x512xf32>
    %93 = arith.addf %91, %92 : vector<8x512xf32>
    %c0_38 = arith.constant 0 : index
    %c0_39 = arith.constant 0 : index
    %94 = vector.load %arg5[%c0_38, %c0_39] : memref<8x512xf32, #tpu.memory_space<vmem>>, vector<8x512xf32>
    tpu.vector_store %arg5[%c0_38, %c0_39], %93 {strides = array<i32>} : memref<8x512xf32, #tpu.memory_space<vmem>>, vector<8x512xf32>,
    return
  }
  func.func @transform_0(%arg0: i32) -> (i32, i32) {
    %c0_i32 = arith.constant 0 : i32
    %c0_i32_0 = arith.constant 0 : i32
    return %c0_i32, %arg0 : i32, i32
  }
  func.func @transform_1(%arg0: i32) -> (i32, i32) {
    %c0_i32 = arith.constant 0 : i32
    %c0_i32_0 = arith.constant 0 : i32
    %c0_i32_1 = arith.constant 0 : i32
    return %c0_i32, %c0_i32_0 : i32, i32
  }
  func.func @transform_2(%arg0: i32) -> (i32, i32) {
    %c0_i32 = arith.constant 0 : i32
    %c0_i32_0 = arith.constant 0 : i32
    %c0_i32_1 = arith.constant 0 : i32
    return %c0_i32, %c0_i32_0 : i32, i32
  }
  func.func @transform_3(%arg0: i32) -> (i32, i32, i32) {
    %c0_i32 = arith.constant 0 : i32
    %c0_i32_0 = arith.constant 0 : i32
    %c0_i32_1 = arith.constant 0 : i32
    %c0_i32_2 = arith.constant 0 : i32
    return %c0_i32, %c0_i32_0, %c0_i32_1 : i32, i32, i32
  }
  func.func @transform_4(%arg0: i32) -> (i32, i32) {
    %c0_i32 = arith.constant 0 : i32
    %c0_i32_0 = arith.constant 0 : i32
    return %c0_i32, %arg0 : i32, i32
  }
}

</mosaic_0001>

<bundles_post_ra>
// kernel: tpu_custom_call.1
= control target key start
LH: loop header
LB: loop body
LE: loop exit
PB: predicated region body
PF: predicated region fallthrough
CT: control target
= control target key end

     0   :  { %9 = vsyncpa [#allocation3], 0  ;;  %s1343_s0 = inlined_call_operand.hbm [shape: bf16[16,512], index: 0, kind: input, shape index: {}]   ;;  %s1344_s1 = inlined_call_operand.hbm [shape: bf16[16,384], index: 1, kind: input, shape index: {}]   ;;  %s1345_s2 = inlined_call_operand.vmem [shape: f32[16,4], index: 2, kind: input, shape index: {}]   ;;  %s1346_s3 = inlined_call_operand.hbm [shape: f32[9,4,512], index: 3, kind: input, shape index: {}]   ;;  %s1347_s4 = inlined_call_operand.hbm [shape: f32[8,512], index: 4, kind: output, shape index: {}]  }
   0x1   :  { %10 = vsyncpa [#allocation6], 0 }
   0x2   :  { %11 = vsyncpa [#allocation4], 0  ;;  %s919_s15 = smov [#allocation5]   ;;  %s825_s19 = scalar_lea.hbm %s1344_s1, 384 }
   0x3   :  { %s29_s16 = sshll.u32 %s919_s15, 4  ;;  %p826_p0 = scmp.ne.s32.totalorder %s1344_s1, %s825_s19  ;;  %s30_s16 = int_to_ptr.vmem [resolvable:$true] %s29_s16 }
   0x4   :  { %p829_p1 = scmp.lt.u32.totalorder %s825_s19, %s1344_s1 }
   0x6   :  { %p831_p2 = pnand %p829_p1, %p826_p0 }
   0x8   :  { %834 = shalt.err (!%p831_p2)
}
   0x9   :  { %s835_s24 = scalar_lea.vmem %s30_s16, 384  ;;  %p840_p4 = scmp.lt.s32.totalorder %s30_s16, %s30_s16 }
   0xa   :  { %p836_p3 = scmp.ne.s32.totalorder %s30_s16, %s835_s24  ;;  %p841_p5 = scmp.lt.s32.totalorder %s835_s24, %s835_s24 }
   0xc   :  { %p842_p6 = por %p841_p5, %p840_p4 }
   0xe   :  { %p843_p7 = pnand %p842_p6, %p836_p3 }
  0x10   :  { %846 = shalt.err (!%p843_p7)
}
  0x11   :  { %s920_s25 = smov 192   ;;  %s921_s26 = smov 12  }
  0x12   :  { %35 = dma.hbm_to_vmem [thread:$0]  %s1344_s1, 384, %s30_s16, [#allocation6], %s920_s25, %s920_s25, %s921_s26  }
  0x13   :  { %s922_s29 = smov [#allocation2]   ;;  %s847_s7 = scalar_lea.hbm %s1343_s0, 512 }
  0x14   :  { %s17_s30 = sshll.u32 %s922_s29, 4  ;;  %p848_p8 = scmp.ne.s32.totalorder %s1343_s0, %s847_s7  ;;  %s18_s30 = int_to_ptr.vmem [resolvable:$true] %s17_s30 }
  0x15   :  { %p851_p9 = scmp.lt.u32.totalorder %s847_s7, %s1343_s0 }
  0x17   :  { %p853_p10 = pnand %p851_p9, %p848_p8 }
  0x19   :  { %856 = shalt.err (!%p853_p10)
}
  0x1a   :  { %s857_s12 = scalar_lea.vmem %s18_s30, 512  ;;  %p862_p12 = scmp.lt.s32.totalorder %s18_s30, %s18_s30 }
  0x1b   :  { %p858_p11 = scmp.ne.s32.totalorder %s18_s30, %s857_s12  ;;  %p863_p13 = scmp.lt.s32.totalorder %s857_s12, %s857_s12 }
  0x1d   :  { %p864_p0 = por %p863_p13, %p862_p12 }
  0x1f   :  { %p865_p1 = pnand %p864_p0, %p858_p11 }
  0x21   :  { %868 = shalt.err (!%p865_p1)
}
  0x22   :  { %s923_s1 = smov 256   ;;  %s924_s13 = smov 16  }
  0x23   :  { %23 = dma.hbm_to_vmem [thread:$0]  %s1343_s0, 512, %s18_s30, [#allocation3], %s923_s1, %s923_s1, %s924_s13  }
  0x24   :  { %s925_s16 = smov [#allocation7]   ;;  %s869_s20 = scalar_lea.hbm %s1346_s3, 2304 }
  0x25   :  { %s43_s17 = sshll.u32 %s925_s16, 4  ;;  %p870_p2 = scmp.ne.s32.totalorder %s1346_s3, %s869_s20  ;;  %s44_s17 = int_to_ptr.vmem [resolvable:$true] %s43_s17 }
  0x26   :  { %p873_p3 = scmp.lt.u32.totalorder %s869_s20, %s1346_s3 }
  0x28   :  { %p875_p4 = pnand %p873_p3, %p870_p2 }
  0x2a   :  { %878 = shalt.err (!%p875_p4)
}
  0x2b   :  { %s879_s25 = scalar_lea.vmem %s44_s17, 2304  ;;  %p884_p6 = scmp.lt.s32.totalorder %s44_s17, %s44_s17 }
  0x2c   :  { %p880_p5 = scmp.ne.s32.totalorder %s44_s17, %s879_s25  ;;  %p885_p7 = scmp.lt.s32.totalorder %s879_s25, %s879_s25 }
  0x2e   :  { %p886_p8 = por %p885_p7, %p884_p6 }
  0x30   :  { %p887_p9 = pnand %p886_p8, %p880_p5 }
  0x32   :  { %890 = shalt.err (!%p887_p9)
}
  0x33   :  { %49 = dma.hbm_to_vmem [thread:$0]  %s1346_s3, 2304, %s44_s17, [#allocation6], %s923_s1, %s923_s1, %s924_s13  }
  0x34   :  { %913 = dma.done.wait [#allocation3], 512  }
  0x35   :  { %914 = vsyncadd [#allocation3], 4294966784 }
  0x36   :  { %915 = dma.done.wait [#allocation6], 2688  }
  0x37   :  { %916 = vsyncadd [#allocation6], 4294964608  ;;  %v1348_v0 = vmov 0   ;;  %v1004_v1 = vld [vmem:[#allocation2] sm:$0xff]  ;;  %v1006_v2 = vld [vmem:[#allocation2 + $0x10] sm:$0xff]  ;;  %vm94_vm0 = vcmask 130048  }
  0x38   :  { %130 = vmatprep.mubr.bf16.mxu0 %v1348_v0  ;;  %171 = vmatprep.mubr.bf16.mxu1 %v1348_v0  ;;  %v1008_v3 = vld [vmem:[#allocation2 + $0x8] sm:$0xff]  ;;  %v765_v4 = vcombine.high %v1004_v1, %v1006_v2  ;;  %v1012_v5 = vld [vmem:[#allocation2 + $0x18] sm:$0xff]  ;;  %v764_v6 = vcombine.low %v1004_v1, %v1006_v2  ;;  %v1023_v9 = vld [vmem:[%s1345_s2] sm:$0xff]  ;;  %v927_v11 = vmov 1   ;;  %s928_s28 = smov 17   ;;  %s929_s29 = smov 111  }
  0x39   :  { %796 = vset.pattern.permute.xlu0 %v1348_v0  ;;  %v767_v7 = vcombine.high %v1008_v3, %v1012_v5  ;;  %v766_v8 = vcombine.low %v1008_v3, %v1012_v5  ;;  %v1026_v10 = vld [vmem:[#allocation5] sm:$0xff]  ;;  %797 = vset.pattern.permute.xlu1 %v927_v11  ;;  %s930_s30 = smov 15   ;;  %s931_s5 = smov 1   ;;  %v68_v45 = vld [vmem:[%s1345_s2 + $0x8] sm:$0xff]  ;;  %v935_v46 = vmov 2   ;;  %vm504_vm9 = vcmask 1041408  }
  0x3a   :  { %98 = vmatprep.subr.bf16.mxu0 %v765_v4  ;;  %71 = vperm.xlu0 %796, %v1023_v9   ;;  %s932_s6 = smov 127   ;;  %s933_s7 = smov 113   ;;  %vm500_vm10 = vcmask 31744  }
  0x3b   :  { %139 = vmatprep.subr.bf16.mxu1 %v767_v7  ;;  %99 = vmatpush1.bf16.msra.mxu0 %v764_v6  ;;  %s934_s8 = smov 112   ;;  %s937_s2 = smov [#allocation8]  }
  0x3c   :  { %140 = vmatpush1.bf16.msra.mxu1 %v766_v8  ;;  %v221_v8 = vlaneseq  ;;  %s754_s11 = sshll.u32 %s937_s2, 4  ;;  %s755_s11 = int_to_ptr.vmem [resolvable:$true] %s754_s11 }
  0x3d   :  { %s891_s12 = scalar_lea.vmem %s755_s11, 512  ;;  %p896_p11 = scmp.lt.s32.totalorder %s755_s11, %s755_s11 }
  0x3e   :  { %768 = vmatmul.mubr.msk.bf16.vlgmr.msra.gmra.mrb[0].mxu0 %vm94_vm0, %v1026_v10  ;;  %798 = vset.pattern.permute.xlu0 %v935_v46  ;;  %p892_p10 = scmp.ne.s32.totalorder %s755_s11, %s891_s12  ;;  %p897_p12 = scmp.lt.s32.totalorder %s891_s12, %s891_s12 }
  0x3f   :  { %769 = vmatmul.mubr.msk.bf16.vlgmr.msra.gmra.mrb[0].mxu1 %vm94_vm0, %v1026_v10  ;;  %549 = vmatprep.mubr.bf16.mxu0 %v1348_v0 }
  0x40   :  { %592 = vmatprep.mubr.bf16.mxu1 %v1348_v0  ;;  %v1205_v0 = vld [vmem:[#allocation7 + $0x70] sm:$0xff]  ;;  %p898_p13 = por %p897_p12, %p896_p11 }
  0x42   :  { %p899_p0 = pnand %p898_p13, %p892_p10 }
  0xb9   :  { %v72_v12 = vpop.permute.xlu0 %71 }
 0x111   :  { %v132_v13 = vpop.f32.mrb[0].mxu0 }
 0x112   :  { %v133_v14 = vadd.f32 %v132_v13, %v72_v12  ;;  %v173_v15 = vpop.f32.mrb[0].mxu1  ;;  %v134_v16 = vpop.f32.mrb[1].mxu0 }
 0x113   :  { %v174_v17 = vadd.f32 %v173_v15, %v72_v12  ;;  %v175_v18 = vpop.f32.mrb[1].mxu1  ;;  %v136_v19 = vpop.f32.mrb[2].mxu0  ;;  %v135_v21 = vadd.f32 %v134_v16, %v72_v12  ;;  %v1133_v15 = vand.u32 127, %v221_v8  ;;  %v1168_v8 = vld [vmem:[#allocation7 + $0x58] sm:$0xff] }
 0x114   :  { %v180_v20 = vadd.f32 3.0, %v133_v14  ;;  %v176_v22 = vadd.f32 %v175_v18, %v72_v12  ;;  %v177_v23 = vpop.f32.mrb[2].mxu1  ;;  %v137_v24 = vpop.f32.mrb[3].mxu0  ;;  %v201_v12 = vld [vmem:[#allocation7 + $0x40] sm:$0xff]  ;;  %v229_v18 = vld [vmem:[#allocation7 + $0x8] sm:$0xff]  ;;  %v258_v19 = vld [vmem:[#allocation7 + $0x10] sm:$0xff] }
 0x115   :  { %v182_v25 = vadd.f32 3.0, %v174_v17  ;;  %v178_v26 = vpop.f32.mrb[3].mxu1  ;;  %v181_v31 = vadd.f32 3.0, %v135_v21  ;;  %vm252_vm1 = vcmp.lt.s32.totalorder %v1133_v15, 16  ;;  %vm223_vm2 = vcmp.lt.s32.totalorder %v1133_v15, 17 }
 0x116   :  { %v184_v27 = vmax.f32 %v180_v20, 0.0  ;;  %v183_v28 = vadd.f32 3.0, %v176_v22  ;;  %v205_v20 = vcombine.high %v201_v12, %v201_v12  ;;  %v233_v23 = vcombine.high %v229_v18, %v229_v18 }
 0x117   :  { %v186_v29 = vmax.f32 %v182_v25, 0.0  ;;  %v185_v37 = vmax.f32 %v181_v31, 0.0  ;;  %v262_v24 = vcombine.high %v258_v19, %v258_v19  ;;  %v1139_v25 = vld [vmem:[#allocation7 + $0x20] sm:$0xff]  ;;  %vm282_vm3 = vcmp.lt.s32.totalorder %v1133_v15, 15 }
 0x118   :  { %v188_v30 = vmin.f32 %v184_v27, 6.0  ;;  %v187_v32 = vmax.f32 %v183_v28, 0.0  ;;  %v1142_v28 = vld [vmem:[#allocation7 + $0x30] sm:$0xff]  ;;  %vm312_vm4 = vcmp.lt.s32.totalorder %v1133_v15, 1  ;;  %vm342_vm5 = vcmp.lt.s32.totalorder %v1133_v15, 127 }
 0x119   :  { %v190_v33 = vmin.f32 %v186_v29, 6.0  ;;  %v189_v40 = vmin.f32 %v185_v37, 6.0  ;;  %vm372_vm6 = vcmp.lt.s32.totalorder %v1133_v15, 113  ;;  %vm402_vm7 = vcmp.lt.s32.totalorder %v1133_v15, 112 }
 0x11a   :  { %v192_v34 = vmul.f32 %v188_v30, %v133_v14  ;;  %v191_v38 = vmin.f32 %v187_v32, 6.0  ;;  %v202_v14 = vld [vmem:[#allocation7 + $0x48] sm:$0xff]  ;;  %vm432_vm8 = vcmp.lt.s32.totalorder %v1133_v15, 111 }
 0x11b   :  { %v194_v35 = vmul.f32 %v190_v33, %v174_v17  ;;  %v193_v42 = vmul.f32 %v189_v40, %v135_v21  ;;  %v228_v17 = vld [vmem:[#allocation7] sm:$0xff]  ;;  %v259_v33 = vld [vmem:[#allocation7 + $0x18] sm:$0xff] }
 0x11c   :  { %v1034_v36 = vmul.f32 0.16666667, %v192_v34  ;;  %v195_v41 = vmul.f32 %v191_v38, %v176_v22  ;;  %v232_v21 = vcombine.high %v228_v17, %v228_v17  ;;  %v206_v22 = vcombine.high %v202_v14, %v202_v14 }
 0x11d   :  { %v1036_v39 = vmul.f32 0.16666667, %v194_v35  ;;  %v1052_v44 = vmul.f32 0.16666667, %v193_v42  ;;  %v263_v40 = vcombine.high %v259_v33, %v259_v33  ;;  %v292_v42 = vcombine.high %v1139_v25, %v1139_v25 }
 0x11e   :  { %213 = vrot.lane.b32.xlu0 %v1034_v36, %s928_s28  ;;  %v1046_v43 = vmul.f32 0.16666667, %v195_v41  ;;  %v209_v27 = vmul.f32 %v201_v12, %v1034_v36  ;;  %v289_v41 = vld [vmem:[#allocation7 + $0x28] sm:$0xff] }
 0x11f   :  { %217 = vrot.lane.b32.xlu1 %v1036_v39, %s928_s28  ;;  %v210_v30 = vmul.f32 %v205_v20, %v1052_v44  ;;  %v211_v35 = vmul.f32 %v202_v14, %v1036_v39 }
 0x120   :  { %v212_v38 = vmul.f32 %v206_v22, %v1046_v43 }
 0x122   :  { %424 = vrot.lane.b32.xlu0 %v1034_v36, %s929_s29 }
 0x123   :  { %244 = vrot.lane.b32.xlu1 %v1034_v36, %s924_s13 }
 0x126   :  { %219 = vrot.lane.b32.xlu0 %v1046_v43, %s928_s28 }
 0x127   :  { %248 = vrot.lane.b32.xlu1 %v1036_v39, %s924_s13 }
 0x12a   :  { %246 = vrot.lane.b32.xlu0 %v1052_v44, %s924_s13 }
 0x12b   :  { %274 = vrot.lane.b32.xlu1 %v1034_v36, %s930_s30 }
 0x12e   :  { %250 = vrot.lane.b32.xlu0 %v1046_v43, %s924_s13 }
 0x12f   :  { %278 = vrot.lane.b32.xlu1 %v1036_v39, %s930_s30 }
 0x132   :  { %276 = vrot.lane.b32.xlu0 %v1052_v44, %s930_s30 }
 0x133   :  { %304 = vrot.lane.b32.xlu1 %v1034_v36, %s931_s5 }
 0x136   :  { %280 = vrot.lane.b32.xlu0 %v1046_v43, %s930_s30 }
 0x137   :  { %308 = vrot.lane.b32.xlu1 %v1036_v39, %s931_s5 }
 0x13a   :  { %306 = vrot.lane.b32.xlu0 %v1052_v44, %s931_s5 }
 0x13b   :  { %334 = vrot.lane.b32.xlu1 %v1034_v36, %s932_s6 }
 0x13e   :  { %310 = vrot.lane.b32.xlu0 %v1046_v43, %s931_s5 }
 0x13f   :  { %338 = vrot.lane.b32.xlu1 %v1036_v39, %s932_s6 }
 0x142   :  { %336 = vrot.lane.b32.xlu0 %v1052_v44, %s932_s6 }
 0x143   :  { %364 = vrot.lane.b32.xlu1 %v1034_v36, %s933_s7 }
 0x146   :  { %340 = vrot.lane.b32.xlu0 %v1046_v43, %s932_s6 }
 0x147   :  { %368 = vrot.lane.b32.xlu1 %v1036_v39, %s933_s7 }
 0x14a   :  { %366 = vrot.lane.b32.xlu0 %v1052_v44, %s933_s7 }
 0x14b   :  { %394 = vrot.lane.b32.xlu1 %v1034_v36, %s934_s8 }
 0x14e   :  { %370 = vrot.lane.b32.xlu0 %v1046_v43, %s933_s7 }
 0x14f   :  { %215 = vrot.lane.b32.xlu1 %v1052_v44, %s928_s28 }
 0x152   :  { %396 = vrot.lane.b32.xlu0 %v1052_v44, %s934_s8 }
 0x153   :  { %398 = vrot.lane.b32.xlu1 %v1036_v39, %s934_s8 }
 0x156   :  { %400 = vrot.lane.b32.xlu0 %v1046_v43, %s934_s8 }
 0x157   :  { %455 = vperm.xlu1 %797, %v1023_v9  }
 0x15a   :  { %428 = vrot.lane.b32.xlu0 %v1036_v39, %s929_s29  ;;  %v322_v39 = vcombine.high %v1142_v28, %v1142_v28 }
 0x15b   :  { %426 = vrot.lane.b32.xlu1 %v1052_v44, %s929_s29  ;;  %v1161_v44 = vld [vmem:[#allocation7 + $0x50] sm:$0xff] }
 0x15c   :  { %799 = vset.pattern.permute.xlu1 %v935_v46  ;;  %v1164_v46 = vld [vmem:[#allocation7 + $0x38] sm:$0xff] }
 0x15d   :  { %v323_v20 = vcombine.high %v1164_v46, %v1164_v46 }
 0x15e   :  { %487 = vperm.xlu0 %798, %v1023_v9  }
 0x15f   :  { %430 = vrot.lane.b32.xlu1 %v1046_v43, %s929_s29 }
 0x163   :  { %492 = vperm.xlu1 %799, %v68_v45   ;;  %v293_v45 = vcombine.high %v289_v41, %v289_v41 }
 0x190   :  { %v1091_v47 = vpop.permute.xlu0 %213 }
 0x191   :  { %v1093_v48 = vpop.permute.xlu1 %217 }
 0x194   :  { %v1095_v49 = vpop.permute.xlu0 %424 }
 0x195   :  { %v1097_v50 = vpop.permute.xlu1 %244 }
 0x198   :  { %v1099_v51 = vpop.permute.xlu0 %219 }
 0x199   :  { %v1101_v52 = vpop.permute.xlu1 %248  ;;  %v227_v12 = vsel %vm223_vm2, %v1099_v51, %v1091_v47 }
 0x19c   :  { %v247_v53 = vpop.permute.xlu0 %246 }
 0x19d   :  { %v1103_v54 = vpop.permute.xlu1 %274  ;;  %v255_v34 = vsel %vm252_vm1, %v1097_v50, %v247_v53  ;;  %v254_v14 = vsel %vm252_vm1, %v247_v53, %v1101_v52  ;;  %v224_v53 = vsel %vm223_vm2, %v1093_v48, %v1099_v51 }
 0x1a0   :  { %v1105_v55 = vpop.permute.xlu0 %250 }
 0x1a1   :  { %v1107_v56 = vpop.permute.xlu1 %278 }
 0x1a4   :  { %v1109_v57 = vpop.permute.xlu0 %276 }
 0x1a5   :  { %v1111_v58 = vpop.permute.xlu1 %304  ;;  %v285_v22 = vsel %vm282_vm3, %v1103_v54, %v1109_v57  ;;  %v284_v51 = vsel %vm282_vm3, %v1109_v57, %v1107_v56  ;;  %v412_v57 = vcombine.high %v1205_v0, %v1205_v0 }
 0x1a8   :  { %v1113_v59 = vpop.permute.xlu0 %280 }
 0x1a9   :  { %v1115_v60 = vpop.permute.xlu1 %308 }
 0x1ac   :  { %v1117_v61 = vpop.permute.xlu0 %306 }
 0x1ad   :  { %v1119_v62 = vpop.permute.xlu1 %334 }
 0x1b0   :  { %v1121_v63 = vpop.permute.xlu0 %310 }
 0x1b1   :  { %v1123_v4 = vpop.permute.xlu1 %338 }
 0x1b4   :  { %v1127_v7 = vpop.permute.xlu0 %336 }
 0x1b5   :  { %v1125_v6 = vpop.permute.xlu1 %364 }
 0x1b8   :  { %v1131_v13 = vpop.permute.xlu0 %340 }
 0x1b9   :  { %v1129_v11 = vpop.permute.xlu1 %368 }
 0x1bc   :  { %v1144_v29 = vpop.permute.xlu0 %366 }
 0x1bd   :  { %v1135_v16 = vpop.permute.xlu1 %394 }
 0x1c1   :  { %v216_v26 = vpop.permute.xlu1 %215 }
 0x1c2   :  { %v225_v31 = vsel %vm223_vm2, %v216_v26, %v1093_v48  ;;  %v226_v32 = vsel %vm223_vm2, %v1091_v47, %v216_v26  ;;  %v352_v47 = vcombine.high %v1161_v44, %v1161_v44  ;;  %v253_v48 = vsel %vm252_vm1, %v1101_v52, %v1105_v55 }
 0x1c3   :  { %v237_v36 = vmul.f32 %v232_v21, %v226_v32  ;;  %v238_v37 = vmul.f32 %v229_v18, %v225_v31  ;;  %v267_v18 = vmul.f32 %v262_v24, %v255_v34  ;;  %v1179_v21 = vld [vmem:[#allocation7 + $0x60] sm:$0xff]  ;;  %v353_v24 = vcombine.high %v1168_v8, %v1168_v8  ;;  %v1197_v32 = vpop.permute.xlu0 %370 }
 0x1c4   :  { %v236_v34 = vmul.f32 %v228_v17, %v227_v12  ;;  %v297_v17 = vmul.f32 %v292_v42, %v285_v22  ;;  %v315_v52 = vsel %vm312_vm4, %v1111_v58, %v1117_v61  ;;  %v1228_v42 = vld [vmem:[#allocation7 + $0x78] sm:$0xff]  ;;  %v298_v22 = vmul.f32 %v289_v41, %v284_v51 }
 0x1c5   :  { %v241_v43 = vadd.f32 %v237_v36, %v210_v30  ;;  %v242_v26 = vadd.f32 %v238_v37, %v211_v35  ;;  %v1188_v30 = vld [vmem:[#allocation7 + $0x68] sm:$0xff]  ;;  %v268_v36 = vmul.f32 %v259_v33, %v254_v14  ;;  %v256_v35 = vsel %vm252_vm1, %v1105_v55, %v1097_v50 }
 0x1c6   :  { %v382_v37 = vcombine.high %v1179_v21, %v1179_v21  ;;  %v383_v33 = vcombine.high %v1188_v30, %v1188_v30  ;;  %v239_v50 = vmul.f32 %v233_v23, %v224_v53  ;;  %v266_v12 = vmul.f32 %v258_v19, %v256_v35 }
 0x1c7   :  { %v271_v31 = vadd.f32 %v267_v18, %v241_v43  ;;  %v286_v43 = vsel %vm282_vm3, %v1113_v59, %v1103_v54  ;;  %v272_v55 = vadd.f32 %v268_v36, %v242_v26  ;;  %v240_v23 = vadd.f32 %v236_v34, %v209_v27 }
 0x1c8   :  { %v269_v18 = vmul.f32 %v263_v40, %v253_v48  ;;  %v283_v54 = vsel %vm282_vm3, %v1107_v56, %v1113_v59  ;;  %v296_v53 = vmul.f32 %v1139_v25, %v286_v43  ;;  %v314_v19 = vsel %vm312_vm4, %v1117_v61, %v1115_v60  ;;  %v397_v40 = vpop.permute.xlu0 %396 }
 0x1c9   :  { %v301_v14 = vadd.f32 %v297_v17, %v271_v31  ;;  %v327_v26 = vmul.f32 %v322_v39, %v315_v52  ;;  %v316_v27 = vsel %vm312_vm4, %v1121_v63, %v1111_v58  ;;  %v243_v41 = vadd.f32 %v239_v50, %v212_v38 }
 0x1ca   :  { %v344_v56 = vsel %vm342_vm5, %v1127_v7, %v1123_v4  ;;  %v302_v59 = vadd.f32 %v298_v22, %v272_v55  ;;  %v413_v25 = vcombine.high %v1228_v42, %v1228_v42  ;;  %v270_v31 = vadd.f32 %v266_v12, %v240_v23 }
 0x1cb   :  { %v299_v34 = vmul.f32 %v293_v45, %v283_v54  ;;  %v313_v61 = vsel %vm312_vm4, %v1115_v60, %v1121_v63  ;;  %v331_v39 = vadd.f32 %v327_v26, %v301_v14  ;;  %v273_v58 = vadd.f32 %v269_v18, %v243_v41  ;;  %v399_v63 = vpop.permute.xlu1 %398 }
 0x1cc   :  { %v328_v38 = vmul.f32 %v1164_v46, %v314_v19  ;;  %v326_v36 = vmul.f32 %v1142_v28, %v316_v27  ;;  %v345_v35 = vsel %vm342_vm5, %v1119_v62, %v1127_v7  ;;  %v300_v48 = vadd.f32 %v296_v53, %v270_v31  ;;  %v401_v43 = vpop.permute.xlu0 %400 }
 0x1cd   :  { %v357_v51 = vmul.f32 %v352_v47, %v344_v56  ;;  %v343_v45 = vsel %vm342_vm5, %v1123_v4, %v1131_v13  ;;  %v346_v60 = vsel %vm342_vm5, %v1131_v13, %v1119_v62  ;;  %v329_v46 = vmul.f32 %v323_v20, %v313_v61  ;;  %v438_v62 = vld [vmem:[#allocation7 + $0x80] sm:$0xff] }
 0x1ce   :  { %v374_v28 = vsel %vm372_vm6, %v1144_v29, %v1129_v11  ;;  %v375_v7 = vsel %vm372_vm6, %v1125_v6, %v1144_v29  ;;  %v332_v47 = vadd.f32 %v328_v38, %v302_v59  ;;  %v303_v17 = vadd.f32 %v299_v34, %v273_v58 }
 0x1cf   :  { %v356_v4 = vmul.f32 %v1161_v44, %v345_v35  ;;  %v361_v50 = vadd.f32 %v357_v51, %v331_v39  ;;  %v330_v13 = vadd.f32 %v326_v36, %v300_v48  ;;  %v358_v20 = vmul.f32 %v1168_v8, %v343_v45  ;;  %v439_v8 = vld [vmem:[#allocation7 + $0x88] sm:$0xff] }
 0x1d0   :  { %v359_v52 = vmul.f32 %v353_v24, %v346_v60  ;;  %v405_v55 = vsel %vm402_vm7, %v1135_v16, %v397_v40  ;;  %v386_v12 = vmul.f32 %v1179_v21, %v375_v7  ;;  %v387_v29 = vmul.f32 %v382_v37, %v374_v28  ;;  %v429_v56 = vpop.permute.xlu0 %428 }
 0x1d1   :  { %v373_v44 = vsel %vm372_vm6, %v1129_v11, %v1197_v32  ;;  %v376_v14 = vsel %vm372_vm6, %v1197_v32, %v1125_v6  ;;  %v333_v24 = vadd.f32 %v329_v46, %v303_v17  ;;  %v362_v18 = vadd.f32 %v358_v20, %v332_v47 }
 0x1d2   :  { %v404_v22 = vsel %vm402_vm7, %v397_v40, %v399_v63  ;;  %v442_v54 = vcombine.high %v438_v62, %v438_v62  ;;  %v360_v21 = vadd.f32 %v356_v4, %v330_v13  ;;  %v391_v37 = vadd.f32 %v387_v29, %v361_v50 }
 0x1d3   :  { %v416_v53 = vmul.f32 %v1205_v0, %v405_v55  ;;  %v406_v11 = vsel %vm402_vm7, %v401_v43, %v1135_v16  ;;  %v388_v19 = vmul.f32 %v1188_v30, %v373_v44  ;;  %v389_v6 = vmul.f32 %v383_v33, %v376_v14 }
 0x1d4   :  { %v443_v32 = vcombine.high %v439_v8, %v439_v8  ;;  %v363_v26 = vadd.f32 %v359_v52, %v333_v24  ;;  %v390_v27 = vadd.f32 %v386_v12, %v360_v21  ;;  %v417_v41 = vmul.f32 %v412_v57, %v404_v22 }
 0x1d5   :  { %v403_v40 = vsel %vm402_vm7, %v399_v63, %v401_v43  ;;  %v392_v0 = vadd.f32 %v388_v19, %v362_v18  ;;  %v419_v31 = vmul.f32 %v413_v25, %v406_v11  ;;  %v66_v18 = vld [vmem:[#allocation5 + $0xc] sm:$0xff] }
 0x1d6   :  { %v456_v23 = vpop.permute.xlu1 %455  ;;  %v420_v30 = vadd.f32 %v416_v53, %v390_v27  ;;  %v421_v33 = vadd.f32 %v417_v41, %v391_v37  ;;  %v393_v58 = vadd.f32 %v389_v6, %v363_v26  ;;  %v418_v57 = vmul.f32 %v1228_v42, %v403_v40 }
 0x1d7   :  { %v1350_v27 = vmov 0  }
 0x1d8   :  { %v422_v48 = vadd.f32 %v418_v57, %v392_v0  ;;  %v423_v51 = vadd.f32 %v419_v31, %v393_v58 }
 0x1da   :  { %v427_v59 = vpop.permute.xlu1 %426 }
 0x1db   :  { %v434_v16 = vsel %vm432_vm8, %v427_v59, %v429_v56  ;;  %v435_v34 = vsel %vm432_vm8, %v1095_v49, %v427_v59 }
 0x1dc   :  { %v446_v61 = vmul.f32 %v438_v62, %v435_v34  ;;  %v447_v39 = vmul.f32 %v442_v54, %v434_v16  ;;  %v635_v34 = vunpack.c.l.bf16 %v1004_v1 }
 0x1dd   :  { %v488_v41 = vpop.permute.xlu0 %487 }
 0x1de   :  { %v450_v38 = vadd.f32 %v446_v61, %v420_v30  ;;  %v451_v36 = vadd.f32 %v447_v39, %v421_v33  ;;  %v431_v35 = vpop.permute.xlu1 %430  ;;  %v639_v30 = vunpack.c.l.bf16 %v1006_v2 }
 0x1df   :  { %v433_v25 = vsel %vm432_vm8, %v429_v56, %v431_v35  ;;  %v436_v45 = vsel %vm432_vm8, %v431_v35, %v1095_v49 }
 0x1e0   :  { %v458_v60 = vadd.f32 %v456_v23, %v450_v38  ;;  %v459_v63 = vadd.f32 %v456_v23, %v451_v36  ;;  %v448_v46 = vmul.f32 %v439_v8, %v433_v25  ;;  %v449_v28 = vmul.f32 %v443_v32, %v436_v45 }
 0x1e1   :  { %v640_v38 = vunpack.c.h.bf16 %v1006_v2  ;;  %v637_v25 = vunpack.c.l.bf16 %v1008_v3 }
 0x1e2   :  { %v462_v7 = vadd.f32 3.0, %v458_v60  ;;  %v463_v47 = vadd.f32 3.0, %v459_v63  ;;  %v452_v17 = vadd.f32 %v448_v46, %v422_v48  ;;  %v453_v42 = vadd.f32 %v449_v28, %v423_v51  ;;  %v493_v56 = vpop.permute.xlu1 %492 }
 0x1e3   :  { %v638_v28 = vunpack.c.h.bf16 %v1008_v3 }
 0x1e4   :  { %v467_v4 = vmax.f32 %v463_v47, 0.0  ;;  %v460_v50 = vadd.f32 %v456_v23, %v452_v17  ;;  %v461_v43 = vadd.f32 %v456_v23, %v453_v42  ;;  %v466_v62 = vmax.f32 %v462_v7, 0.0 }
 0x1e5   :  { %v770_v23 = vcombine.high %v1026_v10, %v66_v18  ;;  %v936_v10 = vmov 3  }
 0x1e6   :  { %v471_v13 = vmin.f32 %v467_v4, 6.0  ;;  %v464_v20 = vadd.f32 3.0, %v460_v50  ;;  %v465_v52 = vadd.f32 3.0, %v461_v43  ;;  %v470_v55 = vmin.f32 %v466_v62, 6.0  ;;  %800 = vset.pattern.permute.xlu1 %v936_v10  ;;  %801 = vset.pattern.permute.xlu0 %v936_v10 }
 0x1e7   :  { %656 = vperm.xlu1 %800, %v1023_v9   ;;  %v636_v9 = vunpack.c.h.bf16 %v1004_v1 }
 0x1e8   :  { %v469_v12 = vmax.f32 %v465_v52, 0.0  ;;  %v475_v29 = vmul.f32 %v471_v13, %v459_v63  ;;  %v474_v15 = vmul.f32 %v470_v55, %v458_v60  ;;  %v468_v49 = vmax.f32 %v464_v20, 0.0 }
 0x1ea   :  { %v473_v44 = vmin.f32 %v469_v12, 6.0  ;;  %v479_v14 = vmul.f32 0.16666667, %v475_v29  ;;  %v478_v8 = vmul.f32 0.16666667, %v474_v15  ;;  %v472_v24 = vmin.f32 %v468_v49, 6.0 }
 0x1ec   :  { %v483_v22 = vpack.c.bf16 %v479_v14, %v479_v14  ;;  %v482_v54 = vpack.c.bf16 %v478_v8, %v478_v8  ;;  %v477_v21 = vmul.f32 %v473_v44, %v461_v43  ;;  %v476_v37 = vmul.f32 %v472_v24, %v460_v50 }
 0x1ee   :  { %771 = vmatprep.subr.msk.bf16.mxu0 %vm504_vm9, %v483_v22  ;;  %v506_v53 = vsel %vm504_vm9, %v482_v54, 0  ;;  %v481_v11 = vmul.f32 0.16666667, %v477_v21  ;;  %v480_v19 = vmul.f32 0.16666667, %v476_v37 }
 0x1ef   :  { %518 = vmatpush1.bf16.msra.mxu0 %v506_v53 }
 0x1f0   :  { %v485_v6 = vpack.c.bf16 %v481_v11, %v481_v11  ;;  %v484_v32 = vpack.c.bf16 %v480_v19, %v480_v19 }
 0x1f2   :  { %772 = vmatmul.mubr.msk.bf16.vlgmr.msra.gmra.mrb[4].mxu0 %vm500_vm10, %v770_v23  ;;  %773 = vmatprep.subr.msk.bf16.mxu1 %vm504_vm9, %v485_v6  ;;  %v512_v26 = vsel %vm504_vm9, %v484_v32, 0  ;;  %v642_v32 = vunpack.c.h.bf16 %v1012_v5 }
 0x1f3   :  { %561 = vmatpush1.bf16.msra.mxu1 %v512_v26  ;;  %694 = vmatprep.mubr.bf16.mxu0 %v1350_v27 }
 0x1f6   :  { %774 = vmatmul.mubr.msk.bf16.vlgmr.msra.gmra.mrb[4].mxu1 %vm500_vm10, %v770_v23  ;;  %v641_v23 = vunpack.c.l.bf16 %v1012_v5 }
 0x1f7   :  { %735 = vmatprep.mubr.bf16.mxu1 %v1350_v27 }
 0x266   :  { %v657_v5 = vpop.permute.xlu1 %656 }
 0x2c5   :  { %v551_v40 = vpop.f32.mrb[4].mxu0 }
 0x2c6   :  { %v553_v59 = vpop.f32.mrb[5].mxu0  ;;  %v552_v0 = vadd.f32 %v551_v40, %v488_v41 }
 0x2c7   :  { %v555_v31 = vpop.f32.mrb[6].mxu0  ;;  %v554_v16 = vadd.f32 %v553_v59, %v488_v41 }
 0x2c8   :  { %v556_v33 = vadd.f32 %v555_v31, %v493_v56  ;;  %v603_v61 = vadd.f32 3.0, %v552_v0  ;;  %v557_v39 = vpop.f32.mrb[7].mxu0 }
 0x2c9   :  { %v604_v58 = vadd.f32 3.0, %v554_v16  ;;  %v558_v57 = vadd.f32 %v557_v39, %v493_v56  ;;  %v594_v36 = vpop.f32.mrb[4].mxu1  ;;  %v65_v16 = vld [vmem:[#allocation5 + $0x8] sm:$0xf] }
 0x2ca   :  { %v607_v35 = vadd.f32 3.0, %v556_v33  ;;  %v611_v48 = vmax.f32 %v603_v61, 0.0  ;;  %v595_v51 = vadd.f32 %v594_v36, %v488_v41  ;;  %v596_v45 = vpop.f32.mrb[5].mxu1 }
 0x2cb   :  { %v612_v60 = vmax.f32 %v604_v58, 0.0  ;;  %v608_v63 = vadd.f32 3.0, %v558_v57  ;;  %v597_v46 = vadd.f32 %v596_v45, %v488_v41  ;;  %v598_v7 = vpop.f32.mrb[6].mxu1 }
 0x2cc   :  { %v615_v47 = vmax.f32 %v607_v35, 0.0  ;;  %v619_v17 = vmin.f32 %v611_v48, 6.0  ;;  %v605_v42 = vadd.f32 3.0, %v595_v51  ;;  %v599_v4 = vadd.f32 %v598_v7, %v493_v56  ;;  %v600_v2 = vpop.f32.mrb[7].mxu1 }
 0x2cd   :  { %v620_v50 = vmin.f32 %v612_v60, 6.0  ;;  %v616_v43 = vmax.f32 %v608_v63, 0.0  ;;  %v606_v1 = vadd.f32 3.0, %v597_v46  ;;  %v601_v62 = vadd.f32 %v600_v2, %v493_v56 }
 0x2ce   :  { %v623_v13 = vmin.f32 %v615_v47, 6.0  ;;  %v627_v20 = vmul.f32 0.16666667, %v619_v17  ;;  %v613_v52 = vmax.f32 %v605_v42, 0.0  ;;  %v609_v55 = vadd.f32 3.0, %v599_v4 }
 0x2cf   :  { %v628_v12 = vmul.f32 0.16666667, %v620_v50  ;;  %v624_v29 = vmin.f32 %v616_v43, 6.0  ;;  %v614_v15 = vmax.f32 %v606_v1, 0.0  ;;  %v610_v49 = vadd.f32 3.0, %v601_v62 }
 0x2d0   :  { %v631_v44 = vmul.f32 0.16666667, %v623_v13  ;;  %v643_v3 = vmul.f32 %v635_v34, %v627_v20  ;;  %v621_v14 = vmin.f32 %v613_v52, 6.0  ;;  %v617_v8 = vmax.f32 %v609_v55, 0.0 }
 0x2d1   :  { %v632_v24 = vmul.f32 0.16666667, %v624_v29  ;;  %v622_v18 = vmin.f32 %v614_v15, 6.0  ;;  %v618_v22 = vmax.f32 %v610_v49, 0.0  ;;  %v644_v54 = vmul.f32 %v636_v9, %v628_v12 }
 0x2d2   :  { %v629_v21 = vmul.f32 0.16666667, %v621_v14  ;;  %v625_v37 = vmin.f32 %v617_v8, 6.0  ;;  %v647_v53 = vmul.f32 %v639_v30, %v631_v44 }
 0x2d3   :  { %v648_v11 = vmul.f32 %v640_v38, %v632_v24  ;;  %v630_v19 = vmul.f32 0.16666667, %v622_v18  ;;  %v626_v6 = vmin.f32 %v618_v22, 6.0 }
 0x2d4   :  { %v633_v26 = vmul.f32 0.16666667, %v625_v37  ;;  %v651_v27 = vpack.c.bf16 %v647_v53, %v643_v3  ;;  %v645_v40 = vmul.f32 %v637_v25, %v629_v21 }
 0x2d5   :  { %v634_v10 = vmul.f32 0.16666667, %v626_v6  ;;  %v652_v41 = vpack.c.bf16 %v648_v11, %v644_v54  ;;  %v646_v59 = vmul.f32 %v638_v28, %v630_v19 }
 0x2d6   :  { %v649_v56 = vmul.f32 %v641_v23, %v633_v26 }
 0x2d7   :  { %v650_v0 = vmul.f32 %v642_v32, %v634_v10  ;;  %662 = vmatprep.subr.bf16.mxu0 %v652_v41 }
 0x2d8   :  { %v653_v31 = vpack.c.bf16 %v649_v56, %v645_v40  ;;  %663 = vmatpush1.bf16.msra.mxu0 %v651_v27 }
 0x2d9   :  { %v654_v34 = vpack.c.bf16 %v650_v0, %v646_v59 }
 0x2db   :  { %703 = vmatprep.subr.bf16.mxu1 %v654_v34  ;;  %775 = vmatmul.mubr.msk.bf16.vlgmr.msra.gmra.mrb[8].mxu0 %vm94_vm0, %v65_v16 }
 0x2dc   :  { %704 = vmatpush1.bf16.msra.mxu1 %v653_v31 }
 0x2df   :  { %776 = vmatmul.mubr.msk.bf16.vlgmr.msra.gmra.mrb[8].mxu1 %vm94_vm0, %v65_v16 }
 0x3ae   :  { %v696_v30 = vpop.f32.mrb[8].mxu0 }
 0x3af   :  { %v698_v33 = vpop.f32.mrb[9].mxu0  ;;  %v697_v61 = vadd.f32 %v696_v30, %v657_v5 }
 0x3b0   :  { %v700_v39 = vpop.f32.mrb[10].mxu0  ;;  %v699_v58 = vadd.f32 %v698_v33, %v657_v5 }
 0x3b1   :  { %744 = vst [vmem:[#allocation8] sm:$0xff] %v697_v61  ;;  %v701_v57 = vpop.f32.mrb[11].mxu0 }
 0x3b2   :  { %v737_v38 = vpop.f32.mrb[8].mxu1  ;;  %745 = vst [vmem:[#allocation8 + $0x8] sm:$0xff] %v699_v58 }
 0x3b3   :  { %v739_v36 = vpop.f32.mrb[9].mxu1  ;;  %v738_v9 = vadd.f32 %v737_v38, %v657_v5 }
 0x3b4   :  { %v741_v35 = vpop.f32.mrb[10].mxu1  ;;  %v740_v48 = vadd.f32 %v739_v36, %v657_v5 }
 0x3b5   :  { %746 = vst [vmem:[#allocation8 + $0x10] sm:$0xff] %v738_v9  ;;  %v742_v51 = vpop.f32.mrb[11].mxu1 }
 0x3b6   :  { %747 = vst [vmem:[#allocation8 + $0x18] sm:$0xff] %v740_v48 }
 0x3b7   :  { %902 = shalt.err (!%p899_p0)
}
 0x3b8   :  { %s903_s14 = scalar_lea.hbm %s1347_s4, 512 }
 0x3b9   :  { %p904_p1 = scmp.ne.s32.totalorder %s1347_s4, %s903_s14  ;;  %p907_p2 = scmp.lt.u32.totalorder %s903_s14, %s1347_s4 }
 0x3bb   :  { %p909_p3 = pnand %p907_p2, %p904_p1 }
 0x3bd   :  { %912 = shalt.err (!%p909_p3)
}
 0x3be   :  { %757 = dma.vmem_to_hbm [thread:$0]  %s755_s11, 512, %s1347_s4, [#allocation4]  }
 0x3bf   :  { %917 = dma.done.wait [#allocation4], 512  }
 0x3c0   :  { %918 = vsyncadd [#allocation4], 4294966784 }
 0x3c1   :  { %761 = vsyncpa [#allocation3], 1 }
 0x3c2   :  { %762 = vsyncpa [#allocation6], 1 }
 0x3c3   :  { %763 = vsyncpa [#allocation4], 1 }

</bundles_post_ra>
